<compile_context>
chip_gen: v7x
topology: tpu7x:2x2x1
jax: 0.10.0
libtpu: 0.0.40
codegen_flags: <defaults>
</compile_context>

<pallas_src>
import functools

import jax
import jax.numpy as jnp
from jax.experimental import pallas as pl
from jax.experimental.pallas import tpu as pltpu

BN_EPS = 1e-5   # torch.nn.BatchNorm1d default eps
LANE = 128
SUBLANE = 8


def _round_up(x, m):
    return (x + m - 1) // m * m


def _fused_gnn_kernel(eps_ref,                              # SMEM  (L,)        f32
                      h_ref, e_ref, S_ref, DT_ref,          # VMEM  data
                      we_ref, be_ref, w1_ref, b1_ref,       # VMEM  stacked params
                      w2_ref, b2_ref, gamma_ref, beta_ref,
                      out_ref,
                      *, num_layers: int, n_real: int):
    """All GINE layers + BatchNorm1d (+ ReLU on non-final layers) fused in one kernel."""
    h = h_ref[...]                                  # [Np, Dp]  f32 (padded)
    e_bf = e_ref[...].astype(jnp.bfloat16)          # [Ep, Dep] bf16 MXU operand
    S = S_ref[...]                                  # [Ep, Np]  bf16 (one-hot, exact)
    DT = DT_ref[...]                                # [Np, Ep]  bf16 (one-hot, exact)

    n_pad = h.shape[0]
    inv_n = jnp.float32(1.0 / n_real)
    # Mask so padded node rows never enter BatchNorm statistics.
    row_ids = jax.lax.broadcasted_iota(jnp.int32, (n_pad, 1), 0)
    row_mask = (row_ids < n_real).astype(jnp.float32)          # [Np, 1]

    for l in range(num_layers):                     # static unroll over layers
        eps = eps_ref[l]                            # scalar from SMEM
        h_bf = h.astype(jnp.bfloat16)

        # Edge encoder: Linear(edge_dim -> din)                         [Ep, Dp]
        e_enc = jnp.dot(e_bf, we_ref[l], preferred_element_type=jnp.float32) + be_ref[l]
        # Gather source-node features via incidence matmul              [Ep, Dp]
        h_src = jnp.dot(S, h_bf, preferred_element_type=jnp.float32)
        # GINE message + sum aggregation at destinations                [Np, Dp]
        msg = jnp.maximum(h_src + e_enc, 0.0)
        agg = jnp.dot(DT, msg.astype(jnp.bfloat16), preferred_element_type=jnp.float32)

        # (1 + eps) * h + agg, then MLP: Linear -> ReLU -> Linear
        z = (1.0 + eps) * h + agg
        t = jnp.maximum(
            jnp.dot(z.astype(jnp.bfloat16), w1_ref[l],
                    preferred_element_type=jnp.float32) + b1_ref[l], 0.0)
        u = jnp.dot(t.astype(jnp.bfloat16), w2_ref[l],
                    preferred_element_type=jnp.float32) + b2_ref[l]

        # BatchNorm1d: training-mode batch stats over REAL node rows, single pass
        # (var = E[u^2] - mean^2; padded lane columns stay exactly zero).
        um = u * row_mask
        mean = jnp.sum(um, axis=0, keepdims=True) * inv_n
        ex2 = jnp.sum(um * u, axis=0, keepdims=True) * inv_n
        var = jnp.maximum(ex2 - mean * mean, 0.0)
        y = (u - mean) * jax.lax.rsqrt(var + BN_EPS) * gamma_ref[l] + beta_ref[l]

        if l != num_layers - 1:
            y = jnp.maximum(y, 0.0)
        h = y

    out_ref[...] = h


def homogeneous_edge_graph_model(h, e, src, dst, layer_params, JK="last"):
    """Pad/stack everything, run one fused pallas_call, slice the real output back."""
    if JK != "last":
        # TODO(synk): JK='sum' would add representations of different widths (torch
        # semantics require inp_dim == out_dim); only 'last' is fused in-kernel here.
        raise NotImplementedError("only JK='last' is implemented")

    N, inp_dim = h.shape
    E, edge_dim = e.shape
    num_layers = len(layer_params)
    out_dim = layer_params[-1]["w2"].shape[1]

    Dp = _round_up(max(inp_dim, out_dim), LANE)     # lane-dense feature dim
    Dep = _round_up(edge_dim, LANE)
    Np = _round_up(N, SUBLANE)
    Ep = _round_up(E, SUBLANE)

    # Padded inputs (only lane/sublane padding; padded rows handled by row mask in BN).
    h_p = jnp.zeros((Np, Dp), jnp.float32).at[:N, :inp_dim].set(h)
    e_p = jnp.zeros((Ep, Dep), jnp.float32).at[:E, :edge_dim].set(e)
    S = jnp.zeros((Ep, Np), jnp.float32).at[jnp.arange(E), src].set(1.0).astype(jnp.bfloat16)
    DT = jnp.zeros((Np, Ep), jnp.float32).at[dst, jnp.arange(E)].set(1.0).astype(jnp.bfloat16)

    # Stacked, zero-padded per-layer parameters (uniform shapes across layers).
    we = jnp.zeros((num_layers, Dep, Dp), jnp.float32)
    be = jnp.zeros((num_layers, 1, Dp), jnp.float32)
    w1 = jnp.zeros((num_layers, Dp, Dp), jnp.float32)
    b1 = jnp.zeros((num_layers, 1, Dp), jnp.float32)
    w2 = jnp.zeros((num_layers, Dp, Dp), jnp.float32)
    b2 = jnp.zeros((num_layers, 1, Dp), jnp.float32)
    gamma = jnp.zeros((num_layers, 1, Dp), jnp.float32)
    beta = jnp.zeros((num_layers, 1, Dp), jnp.float32)
    eps = jnp.zeros((num_layers,), jnp.float32)
    for l, p in enumerate(layer_params):
        din = p["w1"].shape[0]
        we = we.at[l, :edge_dim, :din].set(p["we"])
        be = be.at[l, :, :din].set(p["be"])
        w1 = w1.at[l, :din, :out_dim].set(p["w1"])
        b1 = b1.at[l, :, :out_dim].set(p["b1"])
        w2 = w2.at[l, :out_dim, :out_dim].set(p["w2"])
        b2 = b2.at[l, :, :out_dim].set(p["b2"])
        gamma = gamma.at[l, :, :out_dim].set(p["gamma"])
        beta = beta.at[l, :, :out_dim].set(p["beta"])
        eps = eps.at[l].set(p["eps"].reshape(()))
    # bf16 MXU operands (f32 accumulation in-kernel); biases/BN params stay f32.
    we = we.astype(jnp.bfloat16)
    w1 = w1.astype(jnp.bfloat16)
    w2 = w2.astype(jnp.bfloat16)

    kernel = functools.partial(_fused_gnn_kernel, num_layers=num_layers, n_real=N)
    vmem = pl.BlockSpec(memory_space=pltpu.MemorySpace.VMEM)
    smem = pl.BlockSpec(memory_space=pltpu.MemorySpace.SMEM)

    out_p = pl.pallas_call(
        kernel,
        out_shape=jax.ShapeDtypeStruct((Np, Dp), jnp.float32),
        in_specs=[smem] + [vmem] * 12,
        out_specs=vmem,
    )(eps, h_p, e_p, S, DT, we, be, w1, b1, w2, b2, gamma, beta)

    return out_p[:N, :out_dim]


def init_params(key, num_layers, inp_dim, out_dim, edge_dim):
    """Deterministic synthetic parameter init (fresh BatchNorm: gamma=1, beta=0; GINE eps=0)."""
    params = []
    for layer in range(num_layers):
        din = inp_dim if layer == 0 else out_dim
        key, k_we, k_w1, k_w2 = jax.random.split(key, 4)
        params.append(dict(
            we=0.1 * jax.random.normal(k_we, (edge_dim, din), jnp.float32),
            be=jnp.zeros((1, din), jnp.float32),
            eps=jnp.zeros((1, 1), jnp.float32),
            w1=0.1 * jax.random.normal(k_w1, (din, out_dim), jnp.float32),
            b1=jnp.zeros((1, out_dim), jnp.float32),
            w2=0.1 * jax.random.normal(k_w2, (out_dim, out_dim), jnp.float32),
            b2=jnp.zeros((1, out_dim), jnp.float32),
            gamma=jnp.ones((1, out_dim), jnp.float32),
            beta=jnp.zeros((1, out_dim), jnp.float32),
        ))
    return params


if __name__ == "__main__":
    key = jax.random.PRNGKey(0)
    N, E = 16, 32                      # nodes, edges
    inp_dim, out_dim, edge_dim = 8, 16, 4
    num_layers = 2

    k_h, k_e, k_src, k_dst, k_p = jax.random.split(key, 5)
    h = jax.random.normal(k_h, (N, inp_dim), dtype=jnp.float32)      # g.ndata['feat']
    e = jax.random.normal(k_e, (E, edge_dim), dtype=jnp.float32)     # g.edata['feat']
    src = jax.random.randint(k_src, (E,), 0, N)
    dst = jax.random.randint(k_dst, (E,), 0, N)

    params = init_params(k_p, num_layers, inp_dim, out_dim, edge_dim)

    out = homogeneous_edge_graph_model(h, e, src, dst, params, JK="last")
    jax.block_until_ready(out)
    assert out.shape == (N, out_dim) and out.dtype == jnp.float32
    print("KERNEL_OK")
</pallas_src>

<mosaic_0001>
module attributes {stable_mosaic.version = 11 : i64} {
  func.func @_fused_gnn_kernel(%arg0: memref<2xf32, #tpu.memory_space<smem>>, %arg1: memref<16x128xf32, #tpu.memory_space<vmem>>, %arg2: memref<32x128xf32, #tpu.memory_space<vmem>>, %arg3: memref<32x16xbf16, #tpu.memory_space<vmem>>, %arg4: memref<16x32xbf16, #tpu.memory_space<vmem>>, %arg5: memref<2x128x128xbf16, #tpu.memory_space<vmem>>, %arg6: memref<2x1x128xf32, #tpu.memory_space<vmem>>, %arg7: memref<2x128x128xbf16, #tpu.memory_space<vmem>>, %arg8: memref<2x1x128xf32, #tpu.memory_space<vmem>>, %arg9: memref<2x128x128xbf16, #tpu.memory_space<vmem>>, %arg10: memref<2x1x128xf32, #tpu.memory_space<vmem>>, %arg11: memref<2x1x128xf32, #tpu.memory_space<vmem>>, %arg12: memref<2x1x128xf32, #tpu.memory_space<vmem>>, %arg13: memref<16x128xf32, #tpu.memory_space<vmem>>) attributes {dimension_semantics = [], scalar_prefetch = 0 : i64, scratch_operands = 0 : i64, tpu.core_type = #tpu.core_type<tc>} {
    %c0 = arith.constant 0 : index
    %c0_0 = arith.constant 0 : index
    %0 = vector.load %arg1[%c0, %c0_0] : memref<16x128xf32, #tpu.memory_space<vmem>>, vector<16x128xf32>
    %c0_1 = arith.constant 0 : index
    %c0_2 = arith.constant 0 : index
    %1 = vector.load %arg2[%c0_1, %c0_2] : memref<32x128xf32, #tpu.memory_space<vmem>>, vector<32x128xf32>
    %2 = arith.truncf %1 : vector<32x128xf32> to vector<32x128xbf16>
    %c0_3 = arith.constant 0 : index
    %c0_4 = arith.constant 0 : index
    %3 = vector.load %arg3[%c0_3, %c0_4] : memref<32x16xbf16, #tpu.memory_space<vmem>>, vector<32x16xbf16>
    %c0_5 = arith.constant 0 : index
    %c0_6 = arith.constant 0 : index
    %4 = vector.load %arg4[%c0_5, %c0_6] : memref<16x32xbf16, #tpu.memory_space<vmem>>, vector<16x32xbf16>
    %5 = tpu.iota {dimensions = array<i32: 0>} : vector<16x1xi32>
    %c16_i32 = arith.constant 16 : i32
    %6 = vector.broadcast %c16_i32 : i32 to vector<16x1xi32>
    %7 = arith.cmpi slt, %5, %6 : vector<16x1xi32>
    %8 = arith.extui %7 : vector<16x1xi1> to vector<16x1xi32>
    %9 = arith.sitofp %8 : vector<16x1xi32> to vector<16x1xf32>
    %c0_7 = arith.constant 0 : index
    %10 = memref.load %arg0[%c0_7] : memref<2xf32, #tpu.memory_space<smem>>
    %11 = arith.truncf %0 : vector<16x128xf32> to vector<16x128xbf16>
    %c0_8 = arith.constant 0 : index
    %c0_9 = arith.constant 0 : index
    %c0_10 = arith.constant 0 : index
    %12 = vector.load %arg5[%c0_8, %c0_9, %c0_10] : memref<2x128x128xbf16, #tpu.memory_space<vmem>>, vector<1x128x128xbf16>
    %13 = vector.shape_cast %12 : vector<1x128x128xbf16> to vector<128x128xbf16>
    %cst = arith.constant dense<0.000000e+00> : vector<32x128xf32>
    %14 = tpu.matmul %2, %13, %cst {dimension_numbers = #tpu.dot_dimension_numbers<[1], [0], [0], [1], [0, 0, 1, 1], [], []>} : vector<32x128xbf16>, vector<128x128xbf16>, vector<32x128xf32> -> vector<32x128xf32>
    %c0_11 = arith.constant 0 : index
    %c0_12 = arith.constant 0 : index
    %c0_13 = arith.constant 0 : index
    %15 = vector.load %arg6[%c0_11, %c0_12, %c0_13] : memref<2x1x128xf32, #tpu.memory_space<vmem>>, vector<1x1x128xf32>
    %16 = vector.shape_cast %15 : vector<1x1x128xf32> to vector<1x128xf32>
    %17 = vector.broadcast %16 : vector<1x128xf32> to vector<32x128xf32>
    %18 = arith.addf %14, %17 : vector<32x128xf32>
    %cst_14 = arith.constant dense<0.000000e+00> : vector<32x128xf32>
    %19 = tpu.matmul %3, %11, %cst_14 {dimension_numbers = #tpu.dot_dimension_numbers<[1], [0], [0], [1], [0, 0, 1, 1], [], []>} : vector<32x16xbf16>, vector<16x128xbf16>, vector<32x128xf32> -> vector<32x128xf32>
    %20 = arith.addf %19, %18 : vector<32x128xf32>
    %cst_15 = arith.constant 0.000000e+00 : f32
    %21 = vector.broadcast %cst_15 : f32 to vector<32x128xf32>
    %22 = arith.maximumf %20, %21 : vector<32x128xf32>
    %23 = arith.truncf %22 : vector<32x128xf32> to vector<32x128xbf16>
    %cst_16 = arith.constant dense<0.000000e+00> : vector<16x128xf32>
    %24 = tpu.matmul %4, %23, %cst_16 {dimension_numbers = #tpu.dot_dimension_numbers<[1], [0], [0], [1], [0, 0, 1, 1], [], []>} : vector<16x32xbf16>, vector<32x128xbf16>, vector<16x128xf32> -> vector<16x128xf32>
    %cst_17 = arith.constant 1.000000e+00 : f32
    %25 = arith.addf %cst_17, %10 : f32
    %26 = vector.broadcast %25 : f32 to vector<16x128xf32>
    %27 = arith.mulf %26, %0 : vector<16x128xf32>
    %28 = arith.addf %27, %24 : vector<16x128xf32>
    %29 = arith.truncf %28 : vector<16x128xf32> to vector<16x128xbf16>
    %c0_18 = arith.constant 0 : index
    %c0_19 = arith.constant 0 : index
    %c0_20 = arith.constant 0 : index
    %30 = vector.load %arg7[%c0_18, %c0_19, %c0_20] : memref<2x128x128xbf16, #tpu.memory_space<vmem>>, vector<1x128x128xbf16>
    %31 = vector.shape_cast %30 : vector<1x128x128xbf16> to vector<128x128xbf16>
    %cst_21 = arith.constant dense<0.000000e+00> : vector<16x128xf32>
    %32 = tpu.matmul %29, %31, %cst_21 {dimension_numbers = #tpu.dot_dimension_numbers<[1], [0], [0], [1], [0, 0, 1, 1], [], []>} : vector<16x128xbf16>, vector<128x128xbf16>, vector<16x128xf32> -> vector<16x128xf32>
    %c0_22 = arith.constant 0 : index
    %c0_23 = arith.constant 0 : index
    %c0_24 = arith.constant 0 : index
    %33 = vector.load %arg8[%c0_22, %c0_23, %c0_24] : memref<2x1x128xf32, #tpu.memory_space<vmem>>, vector<1x1x128xf32>
    %34 = vector.shape_cast %33 : vector<1x1x128xf32> to vector<1x128xf32>
    %35 = vector.broadcast %34 : vector<1x128xf32> to vector<16x128xf32>
    %36 = arith.addf %32, %35 : vector<16x128xf32>
    %cst_25 = arith.constant 0.000000e+00 : f32
    %37 = vector.broadcast %cst_25 : f32 to vector<16x128xf32>
    %38 = arith.maximumf %36, %37 : vector<16x128xf32>
    %39 = arith.truncf %38 : vector<16x128xf32> to vector<16x128xbf16>
    %c0_26 = arith.constant 0 : index
    %c0_27 = arith.constant 0 : index
    %c0_28 = arith.constant 0 : index
    %40 = vector.load %arg9[%c0_26, %c0_27, %c0_28] : memref<2x128x128xbf16, #tpu.memory_space<vmem>>, vector<1x128x128xbf16>
    %41 = vector.shape_cast %40 : vector<1x128x128xbf16> to vector<128x128xbf16>
    %cst_29 = arith.constant dense<0.000000e+00> : vector<16x128xf32>
    %42 = tpu.matmul %39, %41, %cst_29 {dimension_numbers = #tpu.dot_dimension_numbers<[1], [0], [0], [1], [0, 0, 1, 1], [], []>} : vector<16x128xbf16>, vector<128x128xbf16>, vector<16x128xf32> -> vector<16x128xf32>
    %c0_30 = arith.constant 0 : index
    %c0_31 = arith.constant 0 : index
    %c0_32 = arith.constant 0 : index
    %43 = vector.load %arg10[%c0_30, %c0_31, %c0_32] : memref<2x1x128xf32, #tpu.memory_space<vmem>>, vector<1x1x128xf32>
    %44 = vector.shape_cast %43 : vector<1x1x128xf32> to vector<1x128xf32>
    %45 = vector.broadcast %44 : vector<1x128xf32> to vector<16x128xf32>
    %46 = arith.addf %42, %45 : vector<16x128xf32>
    %47 = vector.broadcast %9 : vector<16x1xf32> to vector<16x128xf32>
    %48 = arith.mulf %46, %47 : vector<16x128xf32>
    %cst_33 = arith.constant dense<0.000000e+00> : vector<128xf32>
    %49 = vector.multi_reduction <add>, %48, %cst_33 [0] : vector<16x128xf32> to vector<128xf32>
    %50 = vector.shape_cast %49 : vector<128xf32> to vector<1x128xf32>
    %cst_34 = arith.constant 6.250000e-02 : f32
    %51 = vector.broadcast %cst_34 : f32 to vector<1x128xf32>
    %52 = arith.mulf %50, %51 : vector<1x128xf32>
    %53 = arith.mulf %48, %46 : vector<16x128xf32>
    %cst_35 = arith.constant dense<0.000000e+00> : vector<128xf32>
    %54 = vector.multi_reduction <add>, %53, %cst_35 [0] : vector<16x128xf32> to vector<128xf32>
    %55 = vector.shape_cast %54 : vector<128xf32> to vector<1x128xf32>
    %cst_36 = arith.constant 6.250000e-02 : f32
    %56 = vector.broadcast %cst_36 : f32 to vector<1x128xf32>
    %57 = arith.mulf %55, %56 : vector<1x128xf32>
    %58 = arith.mulf %52, %52 : vector<1x128xf32>
    %59 = arith.subf %57, %58 : vector<1x128xf32>
    %cst_37 = arith.constant 0.000000e+00 : f32
    %60 = vector.broadcast %cst_37 : f32 to vector<1x128xf32>
    %61 = arith.maximumf %59, %60 : vector<1x128xf32>
    %62 = vector.broadcast %52 : vector<1x128xf32> to vector<16x128xf32>
    %63 = arith.subf %46, %62 : vector<16x128xf32>
    %cst_38 = arith.constant 9.99999974E-6 : f32
    %64 = vector.broadcast %cst_38 : f32 to vector<1x128xf32>
    %65 = arith.addf %61, %64 : vector<1x128xf32>
    %66 = math.rsqrt %65 : vector<1x128xf32>
    %67 = vector.broadcast %66 : vector<1x128xf32> to vector<16x128xf32>
    %68 = arith.mulf %63, %67 : vector<16x128xf32>
    %c0_39 = arith.constant 0 : index
    %c0_40 = arith.constant 0 : index
    %c0_41 = arith.constant 0 : index
    %69 = vector.load %arg11[%c0_39, %c0_40, %c0_41] : memref<2x1x128xf32, #tpu.memory_space<vmem>>, vector<1x1x128xf32>
    %70 = vector.shape_cast %69 : vector<1x1x128xf32> to vector<1x128xf32>
    %71 = vector.broadcast %70 : vector<1x128xf32> to vector<16x128xf32>
    %72 = arith.mulf %68, %71 : vector<16x128xf32>
    %c0_42 = arith.constant 0 : index
    %c0_43 = arith.constant 0 : index
    %c0_44 = arith.constant 0 : index
    %73 = vector.load %arg12[%c0_42, %c0_43, %c0_44] : memref<2x1x128xf32, #tpu.memory_space<vmem>>, vector<1x1x128xf32>
    %74 = vector.shape_cast %73 : vector<1x1x128xf32> to vector<1x128xf32>
    %75 = vector.broadcast %74 : vector<1x128xf32> to vector<16x128xf32>
    %76 = arith.addf %72, %75 : vector<16x128xf32>
    %cst_45 = arith.constant 0.000000e+00 : f32
    %77 = vector.broadcast %cst_45 : f32 to vector<16x128xf32>
    %78 = arith.maximumf %76, %77 : vector<16x128xf32>
    %c1 = arith.constant 1 : index
    %79 = memref.load %arg0[%c1] : memref<2xf32, #tpu.memory_space<smem>>
    %80 = arith.truncf %78 : vector<16x128xf32> to vector<16x128xbf16>
    %c1_46 = arith.constant 1 : index
    %c0_47 = arith.constant 0 : index
    %c0_48 = arith.constant 0 : index
    %81 = vector.load %arg5[%c1_46, %c0_47, %c0_48] : memref<2x128x128xbf16, #tpu.memory_space<vmem>>, vector<1x128x128xbf16>
    %82 = vector.shape_cast %81 : vector<1x128x128xbf16> to vector<128x128xbf16>
    %cst_49 = arith.constant dense<0.000000e+00> : vector<32x128xf32>
    %83 = tpu.matmul %2, %82, %cst_49 {dimension_numbers = #tpu.dot_dimension_numbers<[1], [0], [0], [1], [0, 0, 1, 1], [], []>} : vector<32x128xbf16>, vector<128x128xbf16>, vector<32x128xf32> -> vector<32x128xf32>
    %c1_50 = arith.constant 1 : index
    %c0_51 = arith.constant 0 : index
    %c0_52 = arith.constant 0 : index
    %84 = vector.load %arg6[%c1_50, %c0_51, %c0_52] : memref<2x1x128xf32, #tpu.memory_space<vmem>>, vector<1x1x128xf32>
    %85 = vector.shape_cast %84 : vector<1x1x128xf32> to vector<1x128xf32>
    %86 = vector.broadcast %85 : vector<1x128xf32> to vector<32x128xf32>
    %87 = arith.addf %83, %86 : vector<32x128xf32>
    %cst_53 = arith.constant dense<0.000000e+00> : vector<32x128xf32>
    %88 = tpu.matmul %3, %80, %cst_53 {dimension_numbers = #tpu.dot_dimension_numbers<[1], [0], [0], [1], [0, 0, 1, 1], [], []>} : vector<32x16xbf16>, vector<16x128xbf16>, vector<32x128xf32> -> vector<32x128xf32>
    %89 = arith.addf %88, %87 : vector<32x128xf32>
    %cst_54 = arith.constant 0.000000e+00 : f32
    %90 = vector.broadcast %cst_54 : f32 to vector<32x128xf32>
    %91 = arith.maximumf %89, %90 : vector<32x128xf32>
    %92 = arith.truncf %91 : vector<32x128xf32> to vector<32x128xbf16>
    %cst_55 = arith.constant dense<0.000000e+00> : vector<16x128xf32>
    %93 = tpu.matmul %4, %92, %cst_55 {dimension_numbers = #tpu.dot_dimension_numbers<[1], [0], [0], [1], [0, 0, 1, 1], [], []>} : vector<16x32xbf16>, vector<32x128xbf16>, vector<16x128xf32> -> vector<16x128xf32>
    %cst_56 = arith.constant 1.000000e+00 : f32
    %94 = arith.addf %cst_56, %79 : f32
    %95 = vector.broadcast %94 : f32 to vector<16x128xf32>
    %96 = arith.mulf %95, %78 : vector<16x128xf32>
    %97 = arith.addf %96, %93 : vector<16x128xf32>
    %98 = arith.truncf %97 : vector<16x128xf32> to vector<16x128xbf16>
    %c1_57 = arith.constant 1 : index
    %c0_58 = arith.constant 0 : index
    %c0_59 = arith.constant 0 : index
    %99 = vector.load %arg7[%c1_57, %c0_58, %c0_59] : memref<2x128x128xbf16, #tpu.memory_space<vmem>>, vector<1x128x128xbf16>
    %100 = vector.shape_cast %99 : vector<1x128x128xbf16> to vector<128x128xbf16>
    %cst_60 = arith.constant dense<0.000000e+00> : vector<16x128xf32>
    %101 = tpu.matmul %98, %100, %cst_60 {dimension_numbers = #tpu.dot_dimension_numbers<[1], [0], [0], [1], [0, 0, 1, 1], [], []>} : vector<16x128xbf16>, vector<128x128xbf16>, vector<16x128xf32> -> vector<16x128xf32>
    %c1_61 = arith.constant 1 : index
    %c0_62 = arith.constant 0 : index
    %c0_63 = arith.constant 0 : index
    %102 = vector.load %arg8[%c1_61, %c0_62, %c0_63] : memref<2x1x128xf32, #tpu.memory_space<vmem>>, vector<1x1x128xf32>
    %103 = vector.shape_cast %102 : vector<1x1x128xf32> to vector<1x128xf32>
    %104 = vector.broadcast %103 : vector<1x128xf32> to vector<16x128xf32>
    %105 = arith.addf %101, %104 : vector<16x128xf32>
    %cst_64 = arith.constant 0.000000e+00 : f32
    %106 = vector.broadcast %cst_64 : f32 to vector<16x128xf32>
    %107 = arith.maximumf %105, %106 : vector<16x128xf32>
    %108 = arith.truncf %107 : vector<16x128xf32> to vector<16x128xbf16>
    %c1_65 = arith.constant 1 : index
    %c0_66 = arith.constant 0 : index
    %c0_67 = arith.constant 0 : index
    %109 = vector.load %arg9[%c1_65, %c0_66, %c0_67] : memref<2x128x128xbf16, #tpu.memory_space<vmem>>, vector<1x128x128xbf16>
    %110 = vector.shape_cast %109 : vector<1x128x128xbf16> to vector<128x128xbf16>
    %cst_68 = arith.constant dense<0.000000e+00> : vector<16x128xf32>
    %111 = tpu.matmul %108, %110, %cst_68 {dimension_numbers = #tpu.dot_dimension_numbers<[1], [0], [0], [1], [0, 0, 1, 1], [], []>} : vector<16x128xbf16>, vector<128x128xbf16>, vector<16x128xf32> -> vector<16x128xf32>
    %c1_69 = arith.constant 1 : index
    %c0_70 = arith.constant 0 : index
    %c0_71 = arith.constant 0 : index
    %112 = vector.load %arg10[%c1_69, %c0_70, %c0_71] : memref<2x1x128xf32, #tpu.memory_space<vmem>>, vector<1x1x128xf32>
    %113 = vector.shape_cast %112 : vector<1x1x128xf32> to vector<1x128xf32>
    %114 = vector.broadcast %113 : vector<1x128xf32> to vector<16x128xf32>
    %115 = arith.addf %111, %114 : vector<16x128xf32>
    %116 = vector.broadcast %9 : vector<16x1xf32> to vector<16x128xf32>
    %117 = arith.mulf %115, %116 : vector<16x128xf32>
    %cst_72 = arith.constant dense<0.000000e+00> : vector<128xf32>
    %118 = vector.multi_reduction <add>, %117, %cst_72 [0] : vector<16x128xf32> to vector<128xf32>
    %119 = vector.shape_cast %118 : vector<128xf32> to vector<1x128xf32>
    %cst_73 = arith.constant 6.250000e-02 : f32
    %120 = vector.broadcast %cst_73 : f32 to vector<1x128xf32>
    %121 = arith.mulf %119, %120 : vector<1x128xf32>
    %122 = arith.mulf %117, %115 : vector<16x128xf32>
    %cst_74 = arith.constant dense<0.000000e+00> : vector<128xf32>
    %123 = vector.multi_reduction <add>, %122, %cst_74 [0] : vector<16x128xf32> to vector<128xf32>
    %124 = vector.shape_cast %123 : vector<128xf32> to vector<1x128xf32>
    %cst_75 = arith.constant 6.250000e-02 : f32
    %125 = vector.broadcast %cst_75 : f32 to vector<1x128xf32>
    %126 = arith.mulf %124, %125 : vector<1x128xf32>
    %127 = arith.mulf %121, %121 : vector<1x128xf32>
    %128 = arith.subf %126, %127 : vector<1x128xf32>
    %cst_76 = arith.constant 0.000000e+00 : f32
    %129 = vector.broadcast %cst_76 : f32 to vector<1x128xf32>
    %130 = arith.maximumf %128, %129 : vector<1x128xf32>
    %131 = vector.broadcast %121 : vector<1x128xf32> to vector<16x128xf32>
    %132 = arith.subf %115, %131 : vector<16x128xf32>
    %cst_77 = arith.constant 9.99999974E-6 : f32
    %133 = vector.broadcast %cst_77 : f32 to vector<1x128xf32>
    %134 = arith.addf %130, %133 : vector<1x128xf32>
    %135 = math.rsqrt %134 : vector<1x128xf32>
    %136 = vector.broadcast %135 : vector<1x128xf32> to vector<16x128xf32>
    %137 = arith.mulf %132, %136 : vector<16x128xf32>
    %c1_78 = arith.constant 1 : index
    %c0_79 = arith.constant 0 : index
    %c0_80 = arith.constant 0 : index
    %138 = vector.load %arg11[%c1_78, %c0_79, %c0_80] : memref<2x1x128xf32, #tpu.memory_space<vmem>>, vector<1x1x128xf32>
    %139 = vector.shape_cast %138 : vector<1x1x128xf32> to vector<1x128xf32>
    %140 = vector.broadcast %139 : vector<1x128xf32> to vector<16x128xf32>
    %141 = arith.mulf %137, %140 : vector<16x128xf32>
    %c1_81 = arith.constant 1 : index
    %c0_82 = arith.constant 0 : index
    %c0_83 = arith.constant 0 : index
    %142 = vector.load %arg12[%c1_81, %c0_82, %c0_83] : memref<2x1x128xf32, #tpu.memory_space<vmem>>, vector<1x1x128xf32>
    %143 = vector.shape_cast %142 : vector<1x1x128xf32> to vector<1x128xf32>
    %144 = vector.broadcast %143 : vector<1x128xf32> to vector<16x128xf32>
    %145 = arith.addf %141, %144 : vector<16x128xf32>
    %c0_84 = arith.constant 0 : index
    %c0_85 = arith.constant 0 : index
    %146 = vector.load %arg13[%c0_84, %c0_85] : memref<16x128xf32, #tpu.memory_space<vmem>>, vector<16x128xf32>
    tpu.vector_store %arg13[%c0_84, %c0_85], %145 {strides = array<i32>} : memref<16x128xf32, #tpu.memory_space<vmem>>, vector<16x128xf32>,
    return
  }
}

</mosaic_0001>

<bundles_post_ra>
// kernel: tpu_custom_call.1
= control target key start
LH: loop header
LB: loop body
LE: loop exit
PB: predicated region body
PF: predicated region fallthrough
CT: control target
= control target key end

     0   :  { %18 = vsyncpa [#allocation5], 0  ;;  %s2003_s0 = inlined_call_operand.hbm [shape: f32[2], index: 0, kind: input, shape index: {}]   ;;  %s2004_s1 = inlined_call_operand.vmem [shape: f32[16,128], index: 1, kind: input, shape index: {}]   ;;  %s2005_s2 = inlined_call_operand.hbm [shape: f32[32,128], index: 2, kind: input, shape index: {}]   ;;  %s2006_s3 = inlined_call_operand.vmem [shape: bf16[32,16], index: 3, kind: input, shape index: {}]   ;;  %s2007_s4 = inlined_call_operand.vmem [shape: bf16[16,32], index: 4, kind: input, shape index: {}]   ;;  %s2008_s5 = inlined_call_operand.hbm [shape: bf16[2,128,128], index: 5, kind: input, shape index: {}]   ;;  %s2009_s6 = inlined_call_operand.vmem [shape: f32[2,1,128], index: 6, kind: input, shape index: {}]   ;;  %s2010_s7 = inlined_call_operand.hbm [shape: bf16[2,128,128], index: 7, kind: input, shape index: {}]   ;;  %s2011_s8 = inlined_call_operand.vmem [shape: f32[2,1,128], index: 8, kind: input, shape index: {}]   ;;  %s2012_s9 = inlined_call_operand.hbm [shape: bf16[2,128,128], index: 9, kind: input, shape index: {}]   ;;  %s2013_s10 = inlined_call_operand.vmem [shape: f32[2,1,128], index: 10, kind: input, shape index: {}]   ;;  %s2014_s11 = inlined_call_operand.vmem [shape: f32[2,1,128], index: 11, kind: input, shape index: {}]   ;;  %s2015_s12 = inlined_call_operand.vmem [shape: f32[2,1,128], index: 12, kind: input, shape index: {}]   ;;  %s2016_s13 = inlined_call_operand.hbm [shape: f32[16,128], index: 13, kind: output, shape index: {}]  }
   0x1   :  { %19 = vsyncpa [#allocation3], 0 }
   0x2   :  { %20 = vsyncpa [#allocation8], 0 }
   0x3   :  { %21 = vsyncpa [#allocation11], 0 }
   0x4   :  { %22 = vsyncpa [#allocation4], 0  ;;  %s1693_s25 = smov [#allocation7]   ;;  %s1563_s29 = scalar_lea.hbm %s2008_s5, 2048 }
   0x5   :  { %s54_s26 = sshll.u32 %s1693_s25, 4  ;;  %p1564_p0 = scmp.ne.s32.totalorder %s2008_s5, %s1563_s29  ;;  %s55_s26 = int_to_ptr.vmem [resolvable:$true] %s54_s26 }
   0x6   :  { %p1567_p1 = scmp.lt.u32.totalorder %s1563_s29, %s2008_s5 }
   0x8   :  { %p1569_p2 = pnand %p1567_p1, %p1564_p0 }
   0xa   :  { %1572 = shalt.err (!%p1569_p2)
}
   0xb   :  { %s1573_s17 = scalar_lea.vmem %s55_s26, 2048  ;;  %p1578_p4 = scmp.lt.s32.totalorder %s55_s26, %s55_s26 }
   0xc   :  { %p1574_p3 = scmp.ne.s32.totalorder %s55_s26, %s1573_s17  ;;  %p1579_p5 = scmp.lt.s32.totalorder %s1573_s17, %s1573_s17 }
   0xe   :  { %p1580_p6 = por %p1579_p5, %p1578_p4 }
  0x10   :  { %p1581_p7 = pnand %p1580_p6, %p1574_p3 }
  0x12   :  { %1584 = shalt.err (!%p1581_p7)
}
  0x13   :  { %s1694_s18 = smov 64   ;;  %s1695_s19 = smov 4  }
  0x14   :  { %60 = dma.hbm_to_vmem [thread:$0]  %s2008_s5, 2048, %s55_s26, [#allocation8], %s1694_s18, %s1694_s18, %s1695_s19  }
  0x15   :  { %s1585_s24 = scalar_lea.hbm %s2003_s0, 16 }
  0x16   :  { %p1586_p8 = scmp.ne.s32.totalorder %s2003_s0, %s1585_s24  ;;  %p1589_p9 = scmp.lt.u32.totalorder %s1585_s24, %s2003_s0 }
  0x18   :  { %p1591_p10 = pnand %p1589_p9, %p1586_p8 }
  0x1a   :  { %1594 = shalt.err (!%p1591_p10)
}
  0x1b   :  { %s1696_s30 = smov [#allocation2]   ;;  %s1697_s5 = smov [#allocation6]  }
  0x1c   :  { %30 = dma.hbm_to_smem %s2003_s0, 16, %s1696_s30, [#allocation5]  }
  0x1d   :  { %s38_s26 = sshll.u32 %s1697_s5, 4  ;;  %s1595_s20 = scalar_lea.hbm %s2005_s2, 512  ;;  %s39_s26 = int_to_ptr.vmem [resolvable:$true] %s38_s26 }
  0x1e   :  { %p1596_p11 = scmp.ne.s32.totalorder %s2005_s2, %s1595_s20  ;;  %p1599_p12 = scmp.lt.u32.totalorder %s1595_s20, %s2005_s2 }
  0x20   :  { %p1601_p13 = pnand %p1599_p12, %p1596_p11 }
  0x22   :  { %1604 = shalt.err (!%p1601_p13)
}
  0x23   :  { %s1605_s25 = scalar_lea.vmem %s39_s26, 512  ;;  %p1610_p1 = scmp.lt.s32.totalorder %s39_s26, %s39_s26 }
  0x24   :  { %p1606_p0 = scmp.ne.s32.totalorder %s39_s26, %s1605_s25  ;;  %p1611_p2 = scmp.lt.s32.totalorder %s1605_s25, %s1605_s25 }
  0x26   :  { %p1612_p3 = por %p1611_p2, %p1610_p1 }
  0x28   :  { %p1613_p4 = pnand %p1612_p3, %p1606_p0 }
  0x2a   :  { %1616 = shalt.err (!%p1613_p4)
}
  0x2b   :  { %s1698_s0 = smov 128   ;;  %s1699_s27 = smov 8  }
  0x2c   :  { %44 = dma.hbm_to_vmem [thread:$0]  %s2005_s2, 512, %s39_s26, [#allocation3], %s1698_s0, %s1698_s0, %s1699_s27  }
  0x2d   :  { %s1700_s30 = smov [#allocation9]   ;;  %s1701_s15 = smov [#allocation10]  }
  0x2e   :  { %s68_s14 = sshll.u32 %s1700_s30, 4  ;;  %s82_s5 = sshll.u32 %s1701_s15, 4  ;;  %s69_s14 = int_to_ptr.vmem [resolvable:$true] %s68_s14  ;;  %s83_s5 = int_to_ptr.vmem [resolvable:$true] %s82_s5 }
  0x2f   :  { %s1617_s20 = scalar_lea.hbm %s2010_s7, 2048 }
  0x30   :  { %p1618_p5 = scmp.ne.s32.totalorder %s2010_s7, %s1617_s20  ;;  %p1621_p6 = scmp.lt.u32.totalorder %s1617_s20, %s2010_s7 }
  0x32   :  { %p1623_p7 = pnand %p1621_p6, %p1618_p5 }
  0x34   :  { %1626 = shalt.err (!%p1623_p7)
}
  0x35   :  { %s1627_s2 = scalar_lea.vmem %s69_s14, 2048  ;;  %p1632_p9 = scmp.lt.s32.totalorder %s69_s14, %s69_s14 }
  0x36   :  { %p1628_p8 = scmp.ne.s32.totalorder %s69_s14, %s1627_s2  ;;  %p1633_p10 = scmp.lt.s32.totalorder %s1627_s2, %s1627_s2 }
  0x38   :  { %p1634_p11 = por %p1633_p10, %p1632_p9 }
  0x3a   :  { %p1635_p12 = pnand %p1634_p11, %p1628_p8 }
  0x3c   :  { %1638 = shalt.err (!%p1635_p12)
}
  0x3d   :  { %74 = dma.hbm_to_vmem [thread:$0]  %s2010_s7, 2048, %s69_s14, [#allocation8], %s1694_s18, %s1694_s18, %s1695_s19  }
  0x3e   :  { %s1639_s30 = scalar_lea.hbm %s2012_s9, 2048 }
  0x3f   :  { %p1640_p13 = scmp.ne.s32.totalorder %s2012_s9, %s1639_s30  ;;  %p1643_p0 = scmp.lt.u32.totalorder %s1639_s30, %s2012_s9 }
  0x41   :  { %p1645_p1 = pnand %p1643_p0, %p1640_p13 }
  0x43   :  { %1648 = shalt.err (!%p1645_p1)
}
  0x44   :  { %s1649_s21 = scalar_lea.vmem %s83_s5, 2048  ;;  %p1654_p3 = scmp.lt.s32.totalorder %s83_s5, %s83_s5 }
  0x45   :  { %p1650_p2 = scmp.ne.s32.totalorder %s83_s5, %s1649_s21  ;;  %p1655_p4 = scmp.lt.s32.totalorder %s1649_s21, %s1649_s21 }
  0x47   :  { %p1656_p5 = por %p1655_p4, %p1654_p3 }
  0x49   :  { %p1657_p6 = pnand %p1656_p5, %p1650_p2 }
  0x4b   :  { %1660 = shalt.err (!%p1657_p6)
}
  0x4c   :  { %88 = dma.hbm_to_vmem [thread:$0]  %s2012_s9, 2048, %s83_s5, [#allocation11], %s1694_s18, %s1694_s18, %s1695_s19  }
  0x4d   :  { %1683 = dma.done.wait [#allocation5], 16  }
  0x4e   :  { %1684 = vsyncadd [#allocation5], 4294967280 }
  0x4f   :  { %1685 = dma.done.wait [#allocation3], 512  }
  0x50   :  { %1686 = vsyncadd [#allocation3], 4294966784 }
  0x51   :  { %1687 = dma.done.wait [#allocation8], 4096  }
  0x52   :  { %1688 = vsyncadd [#allocation8], 4294963200 }
  0x53   :  { %1689 = dma.done.wait [#allocation11], 2048  }
  0x54   :  { %1690 = vsyncadd [#allocation11], 4294965248 }
  0x55   :  { %110 = sfence }
  0x56   :  { %v1508_v0 = vld [vmem:[#allocation7] sm:$0xff]   ;;  %v1509_v1 = vld [vmem:[#allocation7 + $0x8] sm:$0xff]   ;;  %v1510_v2 = vld [vmem:[#allocation7 + $0x10] sm:$0xff]   ;;  %vm267_vm0 = vcmask 130048   ;;  %v1702_v19 = vmov 0.0   ;;  %vm1703_vm1 = vmmov 0  }
  0x57   :  { %1332 = vmatprep.subr.bf16.mxu0 %v1508_v0  ;;  %v1511_v3 = vld [vmem:[#allocation7 + $0x18] sm:$0xff]   ;;  %v114_v4 = vld [vmem:[#allocation6] sm:$0xff]  ;;  %v115_v5 = vld [vmem:[#allocation6 + $0x8] sm:$0xff]  ;;  %1358 = vmatprep.subr.bf16.mxu1 %v1702_v19  ;;  %vm334_vm2 = vcmask 261120   ;;  %s1704_s2 = smov [#allocation12]  }
  0x58   :  { %1333 = vmatpush3.bf16.msra.mxu0 %v1508_v0  ;;  %v1847_v6 = vpack.c.bf16 %v115_v5, %v114_v4  ;;  %v1512_v7 = vld [vmem:[#allocation7 + $0x20] sm:$0xff]   ;;  %v1513_v8 = vld [vmem:[#allocation7 + $0x28] sm:$0xff]   ;;  %v1514_v9 = vld [vmem:[#allocation7 + $0x30] sm:$0xff]   ;;  %1362 = vmatprep.mubr.msk.bf16.mxu1 %vm1703_vm1, %v1702_v19  ;;  %s1176_s26 = sshll.u32 %s1704_s2, 4  ;;  %s1177_s26 = int_to_ptr.vmem [resolvable:$true] %s1176_s26 }
  0x59   :  { %1334 = vmatprep.subr.bf16.mxu0 %v1509_v1  ;;  %v1515_v10 = vld [vmem:[#allocation7 + $0x38] sm:$0xff]   ;;  %v1853_v11 = vld [vmem:[%s2004_s1] sm:$0xff]  ;;  %v1858_v12 = vld [vmem:[%s2004_s1 + $0x8] sm:$0xff]  ;;  %p1666_p8 = scmp.lt.s32.totalorder %s1177_s26, %s1177_s26 }
  0x5a   :  { %1348 = vmatprep.mubr.bf16.mxu0 %v1847_v6  ;;  %v116_v13 = vld [vmem:[#allocation6 + $0x10] sm:$0xff]  ;;  %v117_v14 = vld [vmem:[#allocation6 + $0x18] sm:$0xff]  ;;  %v136_v15 = vpack.c.bf16 %v1858_v12, %v1853_v11  ;;  %v1865_v16 = vld [vmem:[%s2006_s3] sm:$0xff]  }
  0x5b   :  { %v1867_v17 = vpack.c.bf16 %v117_v14, %v116_v13  ;;  %v1875_v18 = vld [vmem:[%s2006_s3 + $0x8] sm:$0xff]   ;;  %v1191_v20 = vld [vmem:[%s2009_s6] ss:$0 sm:$0xff]  ;;  %v1521_v38 = vld [vmem:[#allocation9 + $0x10] sm:$0xff]   ;;  %s1661_s3 = scalar_lea.vmem %s1177_s26, 256 }
  0x5c   :  { %1335 = vmatpush3.bf16.msra.mxu0 %v1509_v1  ;;  %v1892_v35 = vld [vmem:[%s2007_s4] sm:$0xff]   ;;  %v1520_v37 = vld [vmem:[#allocation9 + $0x8] sm:$0xff]   ;;  %v1522_v39 = vld [vmem:[#allocation9 + $0x18] sm:$0xff]   ;;  %s135_s4 = sld [smem:[#allocation2]]  ;;  %p1662_p7 = scmp.ne.s32.totalorder %s1177_s26, %s1661_s3 }
  0x5d   :  { %1336 = vmatprep.subr.bf16.mxu0 %v1510_v2  ;;  %v1519_v36 = vld [vmem:[#allocation9] sm:$0xff]   ;;  %v1524_v41 = vld [vmem:[#allocation9 + $0x28] sm:$0xff]   ;;  %v1525_v42 = vld [vmem:[#allocation9 + $0x30] sm:$0xff]   ;;  %p1667_p9 = scmp.lt.s32.totalorder %s1661_s3, %s1661_s3 }
  0x5e   :  { %v1523_v40 = vld [vmem:[#allocation9 + $0x20] sm:$0xff]   ;;  %v1526_v43 = vld [vmem:[#allocation9 + $0x38] sm:$0xff]   ;;  %v1528_v45 = vld [vmem:[#allocation10 + $0x8] sm:$0xff]  }
  0x5f   :  { %v1527_v44 = vld [vmem:[#allocation10] sm:$0xff]   ;;  %v1529_v46 = vld [vmem:[#allocation10 + $0x10] sm:$0xff]   ;;  %v1530_v47 = vld [vmem:[#allocation10 + $0x18] sm:$0xff]   ;;  %p1668_p10 = por %p1667_p9, %p1666_p8 }
  0x60   :  { %1337 = vmatpush3.bf16.msra.mxu0 %v1510_v2  ;;  %v1531_v48 = vld [vmem:[#allocation10 + $0x20] sm:$0xff]   ;;  %v1532_v49 = vld [vmem:[#allocation10 + $0x28] sm:$0xff]   ;;  %v1533_v60 = vld [vmem:[#allocation10 + $0x30] sm:$0xff]  }
  0x61   :  { %1338 = vmatprep.subr.bf16.mxu0 %v1511_v3  ;;  %v1534_v61 = vld [vmem:[#allocation10 + $0x38] sm:$0xff]   ;;  %v1206_v62 = vld [vmem:[%s2011_s8] ss:$0 sm:$0xff]  ;;  %v1540_v13 = vld [vmem:[#allocation7 + $0x68] sm:$0xff]   ;;  %p1669_p11 = pnand %p1668_p10, %p1662_p7 }
  0x62   :  { %s379_s28 = sadd.f32 1.0, %s135_s4  ;;  %v1541_v14 = vld [vmem:[#allocation7 + $0x70] sm:$0xff]  }
  0x64   :  { %1339 = vmatpush3.bf16.msra.mxu0 %v1511_v3  ;;  %v380_v50 = vstv %s379_s28 }
  0x65   :  { %1340 = vmatprep.subr.bf16.mxu0 %v1512_v7  ;;  %v381_v51 = vmul.f32 %v380_v50, %v1853_v11  ;;  %v382_v52 = vmul.f32 %v380_v50, %v1858_v12  ;;  %v1538_v11 = vld [vmem:[#allocation7 + $0x58] sm:$0xff]   ;;  %v1539_v12 = vld [vmem:[#allocation7 + $0x60] sm:$0xff]  }
  0x68   :  { %1341 = vmatpush3.bf16.msra.mxu0 %v1512_v7 }
  0x69   :  { %1342 = vmatprep.subr.bf16.mxu0 %v1513_v8 }
  0x6c   :  { %1343 = vmatpush3.bf16.msra.mxu0 %v1513_v8  ;;  %v1535_v8 = vld [vmem:[#allocation7 + $0x40] sm:$0xff]  }
  0x6d   :  { %1344 = vmatprep.subr.bf16.mxu0 %v1514_v9 }
  0x70   :  { %1345 = vmatpush3.bf16.msra.mxu0 %v1514_v9  ;;  %v1536_v9 = vld [vmem:[#allocation7 + $0x48] sm:$0xff]  }
  0x71   :  { %1346 = vmatprep.subr.bf16.mxu0 %v1515_v10 }
  0x74   :  { %1347 = vmatpush3.bf16.msra.mxu0 %v1515_v10  ;;  %v1537_v10 = vld [vmem:[#allocation7 + $0x50] sm:$0xff]  }
  0x75   :  { %1352 = vmatprep.subr.bf16.mxu0 %v136_v15 }
  0x77   :  { %1349 = vmatmul.mubr.bf16.vlgmr.msra.gmra.mrb[0].mxu0 %v1867_v17 }
  0x78   :  { %1353 = vmatpush3.bf16.msra.mxu0 %v136_v15  ;;  %1354 = vmatprep.mubr.msk.bf16.mxu0 %vm267_vm0, %v1865_v16  ;;  %v1542_v15 = vld [vmem:[#allocation7 + $0x78] sm:$0xff]  }
  0x79   :  { %1386 = vmatprep.subr.bf16.mxu0 %v1702_v19 }
  0x83   :  { %1355 = vmatmul.mubr.msk.bf16.vlgmr.msra.gmra.mrb[0].mxu0 %vm267_vm0, %v1875_v18 }
  0x84   :  { %1402 = vmatprep.mubr.msk.bf16.mxu0 %vm1703_vm1, %v1702_v19  ;;  %1387 = vmatpush3.bf16.msra.mxu0 %v1527_v44 }
  0x85   :  { %1388 = vmatprep.subr.bf16.mxu0 %v1702_v19 }
  0x88   :  { %1389 = vmatpush3.bf16.msra.mxu0 %v1528_v45 }
  0x89   :  { %1390 = vmatprep.subr.bf16.mxu0 %v1702_v19 }
  0x8c   :  { %1391 = vmatpush3.bf16.msra.mxu0 %v1529_v46 }
  0x8d   :  { %1392 = vmatprep.subr.bf16.mxu0 %v1702_v19 }
  0x90   :  { %1393 = vmatpush3.bf16.msra.mxu0 %v1530_v47 }
  0x91   :  { %1394 = vmatprep.subr.bf16.mxu0 %v1702_v19 }
  0x94   :  { %1395 = vmatpush3.bf16.msra.mxu0 %v1531_v48 }
  0x95   :  { %1396 = vmatprep.subr.bf16.mxu0 %v1702_v19 }
  0x98   :  { %1397 = vmatpush3.bf16.msra.mxu0 %v1532_v49 }
  0x99   :  { %1398 = vmatprep.subr.bf16.mxu0 %v1702_v19 }
  0x9c   :  { %1399 = vmatpush3.bf16.msra.mxu0 %v1533_v60 }
  0x9d   :  { %1400 = vmatprep.subr.bf16.mxu0 %v1702_v19 }
  0xa0   :  { %1401 = vmatpush3.bf16.msra.mxu0 %v1534_v61 }
  0xa1   :  { %1432 = vmatprep.subr.bf16.mxu0 %v1702_v19 }
 0x156   :  { %v1356_v21 = vpop.f32.mrb[0].mxu0 }
 0x157   :  { %v1480_v22 = vadd.f32 %v1356_v21, %v1191_v20  ;;  %v308_v23 = vpop.f32.mrb[1].mxu0 }
 0x158   :  { %v1481_v24 = vadd.f32 %v1191_v20, %v308_v23  ;;  %v1357_v25 = vpop.f32.mrb[2].mxu0 }
 0x159   :  { %v1482_v26 = vadd.f32 %v1357_v25, %v1191_v20  ;;  %v311_v27 = vpop.f32.mrb[3].mxu0  ;;  %v325_v29 = vmax.f32 %v1480_v22, 0.0 }
 0x15a   :  { %v1483_v28 = vadd.f32 %v1191_v20, %v311_v27  ;;  %v323_v31 = vmax.f32 %v1481_v24, 0.0  ;;  %v1215_v20 = vld [vmem:[%s2013_s10] ss:$0 sm:$0xff] }
 0x15b   :  { %v326_v30 = vmax.f32 %v1482_v26, 0.0 }
 0x15c   :  { %v324_v32 = vmax.f32 %v1483_v28, 0.0 }
 0x15d   :  { %v328_v33 = vpack.c.bf16 %v326_v30, %v325_v29 }
 0x15e   :  { %v327_v34 = vpack.c.bf16 %v324_v32, %v323_v31 }
 0x160   :  { %1359 = vmatpush3.bf16.msra.mxu1 %v327_v34 }
 0x161   :  { %1360 = vmatprep.subr.bf16.mxu1 %v1702_v19 }
 0x164   :  { %1361 = vmatpush3.bf16.msra.mxu1 %v328_v33 }
 0x165   :  { %1366 = vmatprep.subr.bf16.mxu1 %v1702_v19 }
 0x167   :  { %1363 = vmatmul.mubr.msk.bf16.vlgmr.msra.gmra.mrb[0].mxu1 %vm334_vm2, %v1892_v35 }
 0x168   :  { %1367 = vmatpush3.bf16.msra.mxu1 %v1519_v36  ;;  %1382 = vmatprep.mubr.msk.bf16.mxu1 %vm1703_vm1, %v1702_v19 }
 0x169   :  { %1368 = vmatprep.subr.bf16.mxu1 %v1702_v19 }
 0x16c   :  { %1369 = vmatpush3.bf16.msra.mxu1 %v1520_v37 }
 0x16d   :  { %1370 = vmatprep.subr.bf16.mxu1 %v1702_v19 }
 0x170   :  { %1371 = vmatpush3.bf16.msra.mxu1 %v1521_v38 }
 0x171   :  { %1372 = vmatprep.subr.bf16.mxu1 %v1702_v19 }
 0x174   :  { %1373 = vmatpush3.bf16.msra.mxu1 %v1522_v39 }
 0x175   :  { %1374 = vmatprep.subr.bf16.mxu1 %v1702_v19 }
 0x178   :  { %1375 = vmatpush3.bf16.msra.mxu1 %v1523_v40 }
 0x179   :  { %1376 = vmatprep.subr.bf16.mxu1 %v1702_v19 }
 0x17c   :  { %1377 = vmatpush3.bf16.msra.mxu1 %v1524_v41 }
 0x17d   :  { %1378 = vmatprep.subr.bf16.mxu1 %v1702_v19 }
 0x180   :  { %1379 = vmatpush3.bf16.msra.mxu1 %v1525_v42 }
 0x181   :  { %1380 = vmatprep.subr.bf16.mxu1 %v1702_v19 }
 0x184   :  { %1381 = vmatpush3.bf16.msra.mxu1 %v1526_v43 }
 0x185   :  { %1406 = vmatprep.subr.bf16.mxu1 %v1535_v8 }
 0x23a   :  { %v372_v53 = vpop.f32.mrb[0].mxu1 }
 0x23b   :  { %v1364_v54 = vpop.f32.mrb[1].mxu1  ;;  %v383_v56 = vadd.f32 %v381_v51, %v372_v53  ;;  %v1224_v51 = vld [vmem:[%s2014_s11] ss:$0 sm:$0xff] }
 0x23c   :  { %v375_v55 = vpop.f32.mrb[2].mxu1  ;;  %v1225_v54 = vld [vmem:[%s2015_s12] ss:$0 sm:$0xff] }
 0x23d   :  { %v384_v57 = vadd.f32 %v382_v52, %v375_v55  ;;  %v1365_v58 = vpop.f32.mrb[3].mxu1 }
 0x23f   :  { %v385_v59 = vpack.c.bf16 %v384_v57, %v383_v56 }
 0x241   :  { %1383 = vmatmul.mubr.bf16.vlgmr.msra.gmra.mrb[4].mxu1 %v385_v59 }
 0x242   :  { %1422 = vmatprep.mubr.bf16.mxu1 %v1847_v6  ;;  %1407 = vmatpush3.bf16.msra.mxu1 %v1535_v8 }
 0x243   :  { %1408 = vmatprep.subr.bf16.mxu1 %v1536_v9 }
 0x246   :  { %1409 = vmatpush3.bf16.msra.mxu1 %v1536_v9 }
 0x247   :  { %1410 = vmatprep.subr.bf16.mxu1 %v1537_v10 }
 0x24a   :  { %1411 = vmatpush3.bf16.msra.mxu1 %v1537_v10 }
 0x24b   :  { %1412 = vmatprep.subr.bf16.mxu1 %v1538_v11 }
 0x24e   :  { %1413 = vmatpush3.bf16.msra.mxu1 %v1538_v11 }
 0x24f   :  { %1414 = vmatprep.subr.bf16.mxu1 %v1539_v12 }
 0x252   :  { %1415 = vmatpush3.bf16.msra.mxu1 %v1539_v12  ;;  %v1543_v12 = vld [vmem:[#allocation9 + $0x40] sm:$0xff]  }
 0x253   :  { %1416 = vmatprep.subr.bf16.mxu1 %v1540_v13 }
 0x256   :  { %1417 = vmatpush3.bf16.msra.mxu1 %v1540_v13  ;;  %v1544_v13 = vld [vmem:[#allocation9 + $0x48] sm:$0xff]  }
 0x257   :  { %1418 = vmatprep.subr.bf16.mxu1 %v1541_v14 }
 0x25a   :  { %1419 = vmatpush3.bf16.msra.mxu1 %v1541_v14  ;;  %v1545_v14 = vld [vmem:[#allocation9 + $0x50] sm:$0xff]  }
 0x25b   :  { %1420 = vmatprep.subr.bf16.mxu1 %v1542_v15 }
 0x25e   :  { %1421 = vmatpush3.bf16.msra.mxu1 %v1542_v15  ;;  %v1546_v15 = vld [vmem:[#allocation9 + $0x58] sm:$0xff]  }
 0x261   :  { %1423 = vmatmul.mubr.bf16.vlgmr.msra.gmra.mrb[8].mxu1 %v1867_v17 }
 0x262   :  { %1428 = vmatprep.mubr.msk.bf16.mxu1 %vm267_vm0, %v1865_v16 }
 0x314   :  { %v491_v63 = vpop.f32.mrb[4].mxu1 }
 0x315   :  { %v492_v0 = vadd.f32 %v1206_v62, %v491_v63  ;;  %v1384_v1 = vpop.f32.mrb[5].mxu1 }
 0x316   :  { %v494_v2 = vpop.f32.mrb[6].mxu1 }
 0x317   :  { %v495_v3 = vadd.f32 %v1206_v62, %v494_v2  ;;  %v1385_v4 = vpop.f32.mrb[7].mxu1  ;;  %v498_v5 = vmax.f32 %v492_v0, 0.0  ;;  %v1228_v62 = vld [vmem:[%s2009_s6 + $0x1] ss:$0 sm:$0xff]  ;;  %s1226_s6 = sld [smem:[#allocation2 + $0x1]] }
 0x319   :  { %v499_v6 = vmax.f32 %v495_v3, 0.0 }
 0x31b   :  { %v500_v7 = vpack.c.bf16 %v499_v6, %v498_v5 }
 0x31d   :  { %1403 = vmatmul.mubr.bf16.vlgmr.msra.gmra.mrb[4].mxu0 %v500_v7  ;;  %s882_s18 = sadd.f32 1.0, %s1226_s6 }
 0x31e   :  { %1436 = vmatprep.mubr.msk.bf16.mxu0 %vm1703_vm1, %v1702_v19 }
 0x3f0   :  { %v606_v21 = vpop.f32.mrb[4].mxu0 }
 0x3f1   :  { %v607_v22 = vadd.f32 %v1215_v20, %v606_v21  ;;  %v1404_v23 = vpop.f32.mrb[5].mxu0  ;;  %v1549_v21 = vld [vmem:[#allocation9 + $0x70] sm:$0xff]  }
 0x3f2   :  { %v609_v24 = vpop.f32.mrb[6].mxu0  ;;  %v1551_v23 = vld [vmem:[#allocation10 + $0x40] sm:$0xff]  }
 0x3f3   :  { %v610_v25 = vadd.f32 %v1215_v20, %v609_v24  ;;  %v1405_v26 = vpop.f32.mrb[7].mxu0  ;;  %v623_v27 = vmul.f32 %v607_v22, %v607_v22  ;;  %v1547_v20 = vld [vmem:[#allocation9 + $0x60] sm:$0xff]   ;;  %v1552_v24 = vld [vmem:[#allocation10 + $0x48] sm:$0xff]  }
 0x3f4   :  { %v1554_v26 = vld [vmem:[#allocation10 + $0x58] sm:$0xff]  }
 0x3f5   :  { %v615_v28 = vadd.f32 %v610_v25, %v607_v22  ;;  %v624_v29 = vmul.f32 %v610_v25, %v610_v25 }
 0x3f7   :  { %v616_v30 = vrot.slane %v615_v28, 4  ;;  %v625_v31 = vadd.f32 %v624_v29, %v623_v27  ;;  %v1555_v27 = vld [vmem:[#allocation10 + $0x60] sm:$0xff]   ;;  %v883_v29 = vstv %s882_s18 }
 0x3f9   :  { %v617_v32 = vadd.f32 %v616_v30, %v615_v28  ;;  %v626_v17 = vrot.slane %v625_v31, 4  ;;  %v1556_v28 = vld [vmem:[#allocation10 + $0x68] sm:$0xff]  }
 0x3fb   :  { %v618_v33 = vrot.slane %v617_v32, 2  ;;  %v627_v34 = vadd.f32 %v626_v17, %v625_v31 }
 0x3fd   :  { %v619_v16 = vadd.f32 %v618_v33, %v617_v32  ;;  %v628_v36 = vrot.slane %v627_v34, 2 }
 0x3ff   :  { %v620_v37 = vrot.slane %v619_v16, 1  ;;  %v629_v38 = vadd.f32 %v628_v36, %v627_v34 }
 0x401   :  { %v621_v39 = vadd.f32 %v620_v37, %v619_v16  ;;  %v630_v40 = vrot.slane %v629_v38, 1 }
 0x403   :  { %v622_v41 = vmul.f32 0.0625, %v621_v39  ;;  %v631_v42 = vadd.f32 %v630_v40, %v629_v38  ;;  %v1557_v38 = vld [vmem:[#allocation10 + $0x70] sm:$0xff]   ;;  %v1558_v39 = vld [vmem:[#allocation10 + $0x78] sm:$0xff]   ;;  %v1241_v40 = vld [vmem:[%s2011_s8 + $0x1] ss:$0 sm:$0xff] }
 0x405   :  { %v632_v43 = vmul.f32 0.0625, %v631_v42  ;;  %v633_v44 = vmul.f32 %v622_v41, %v622_v41  ;;  %v637_v45 = vsub.f32 %v610_v25, %v622_v41  ;;  %v636_v46 = vsub.f32 %v607_v22, %v622_v41  ;;  %v1550_v22 = vld [vmem:[#allocation9 + $0x78] sm:$0xff]   ;;  %v1553_v25 = vld [vmem:[#allocation10 + $0x50] sm:$0xff]  }
 0x407   :  { %v634_v47 = vsub.f32 %v632_v43, %v633_v44 }
 0x409   :  { %v635_v48 = vmax.f32 %v634_v47, 0.0 }
 0x40b   :  { %v638_v49 = vadd.f32 1e-05, %v635_v48 }
 0x40d   :  { %1559 = vrsqrt.f32 %v638_v49 }
 0x417   :  { %v1560_v50 = vpop.eup %1559 }
 0x418   :  { %v641_v52 = vmul.f32 %v1560_v50, %v637_v45  ;;  %v640_v53 = vmul.f32 %v1560_v50, %v636_v46 }
 0x41a   :  { %v649_v55 = vmul.f32 %v1224_v51, %v640_v53  ;;  %v650_v56 = vmul.f32 %v1224_v51, %v641_v52 }
 0x41c   :  { %v1934_v57 = vadd.f32 %v1225_v54, %v649_v55  ;;  %v1936_v58 = vadd.f32 %v1225_v54, %v650_v56 }
 0x41e   :  { %v660_v59 = vmax.f32 %v1934_v57, 0.0  ;;  %v661_v60 = vmax.f32 %v1936_v58, 0.0 }
 0x420   :  { %v663_v61 = vpack.c.bf16 %v661_v60, %v660_v59  ;;  %v884_v30 = vmul.f32 %v883_v29, %v660_v59  ;;  %v885_v33 = vmul.f32 %v883_v29, %v661_v60 }
 0x422   :  { %1426 = vmatprep.subr.bf16.mxu1 %v663_v61 }
 0x423   :  { %1427 = vmatpush3.bf16.msra.mxu1 %v663_v61 }
 0x424   :  { %1460 = vmatprep.subr.bf16.mxu1 %v1702_v19 }
 0x426   :  { %1429 = vmatmul.mubr.msk.bf16.vlgmr.msra.gmra.mrb[8].mxu1 %vm267_vm0, %v1875_v18 }
 0x427   :  { %1476 = vmatprep.mubr.msk.bf16.mxu1 %vm1703_vm1, %v1702_v19  ;;  %1461 = vmatpush3.bf16.msra.mxu1 %v1551_v23 }
 0x428   :  { %1462 = vmatprep.subr.bf16.mxu1 %v1702_v19 }
 0x42b   :  { %1463 = vmatpush3.bf16.msra.mxu1 %v1552_v24 }
 0x42c   :  { %1464 = vmatprep.subr.bf16.mxu1 %v1702_v19 }
 0x42f   :  { %1465 = vmatpush3.bf16.msra.mxu1 %v1553_v25 }
 0x430   :  { %1466 = vmatprep.subr.bf16.mxu1 %v1702_v19 }
 0x433   :  { %1467 = vmatpush3.bf16.msra.mxu1 %v1554_v26 }
 0x434   :  { %1468 = vmatprep.subr.bf16.mxu1 %v1702_v19 }
 0x437   :  { %1469 = vmatpush3.bf16.msra.mxu1 %v1555_v27 }
 0x438   :  { %1470 = vmatprep.subr.bf16.mxu1 %v1702_v19 }
 0x43b   :  { %1471 = vmatpush3.bf16.msra.mxu1 %v1556_v28 }
 0x43c   :  { %1472 = vmatprep.subr.bf16.mxu1 %v1702_v19 }
 0x43f   :  { %1473 = vmatpush3.bf16.msra.mxu1 %v1557_v38 }
 0x440   :  { %1474 = vmatprep.subr.bf16.mxu1 %v1702_v19 }
 0x443   :  { %1475 = vmatpush3.bf16.msra.mxu1 %v1558_v39 }
 0x4f9   :  { %v1430_v63 = vpop.f32.mrb[8].mxu1 }
 0x4fa   :  { %v1484_v0 = vadd.f32 %v1430_v63, %v1228_v62  ;;  %v820_v1 = vpop.f32.mrb[9].mxu1 }
 0x4fb   :  { %v1485_v2 = vadd.f32 %v1228_v62, %v820_v1  ;;  %v1431_v3 = vpop.f32.mrb[10].mxu1 }
 0x4fc   :  { %v1486_v4 = vadd.f32 %v1431_v3, %v1228_v62  ;;  %v823_v5 = vpop.f32.mrb[11].mxu1  ;;  %v837_v7 = vmax.f32 %v1484_v0, 0.0 }
 0x4fd   :  { %v1487_v6 = vadd.f32 %v1228_v62, %v823_v5  ;;  %v835_v9 = vmax.f32 %v1485_v2, 0.0 }
 0x4fe   :  { %v838_v8 = vmax.f32 %v1486_v4, 0.0 }
 0x4ff   :  { %v836_v10 = vmax.f32 %v1487_v6, 0.0 }
 0x500   :  { %v840_v18 = vpack.c.bf16 %v838_v8, %v837_v7 }
 0x501   :  { %v839_v11 = vpack.c.bf16 %v836_v10, %v835_v9 }
 0x503   :  { %1433 = vmatpush3.bf16.msra.mxu0 %v839_v11 }
 0x504   :  { %1434 = vmatprep.subr.bf16.mxu0 %v1702_v19 }
 0x507   :  { %1435 = vmatpush3.bf16.msra.mxu0 %v840_v18 }
 0x508   :  { %1440 = vmatprep.subr.bf16.mxu0 %v1702_v19 }
 0x50a   :  { %1437 = vmatmul.mubr.msk.bf16.vlgmr.msra.gmra.mrb[8].mxu0 %vm334_vm2, %v1892_v35  ;;  %v1548_v35 = vld [vmem:[#allocation9 + $0x68] sm:$0xff]  }
 0x50b   :  { %1441 = vmatpush3.bf16.msra.mxu0 %v1543_v12  ;;  %1456 = vmatprep.mubr.msk.bf16.mxu0 %vm1703_vm1, %v1702_v19 }
 0x50c   :  { %1442 = vmatprep.subr.bf16.mxu0 %v1702_v19 }
 0x50f   :  { %1443 = vmatpush3.bf16.msra.mxu0 %v1544_v13 }
 0x510   :  { %1444 = vmatprep.subr.bf16.mxu0 %v1702_v19 }
 0x513   :  { %1445 = vmatpush3.bf16.msra.mxu0 %v1545_v14 }
 0x514   :  { %1446 = vmatprep.subr.bf16.mxu0 %v1702_v19 }
 0x517   :  { %1447 = vmatpush3.bf16.msra.mxu0 %v1546_v15 }
 0x518   :  { %1448 = vmatprep.subr.bf16.mxu0 %v1702_v19 }
 0x51b   :  { %1449 = vmatpush3.bf16.msra.mxu0 %v1547_v20  ;;  %v1261_v20 = vld [vmem:[%s2014_s11 + $0x1] ss:$0 sm:$0xff] }
 0x51c   :  { %1450 = vmatprep.subr.bf16.mxu0 %v1702_v19 }
 0x51f   :  { %1451 = vmatpush3.bf16.msra.mxu0 %v1548_v35 }
 0x520   :  { %1452 = vmatprep.subr.bf16.mxu0 %v1702_v19 }
 0x523   :  { %1453 = vmatpush3.bf16.msra.mxu0 %v1549_v21 }
 0x524   :  { %1454 = vmatprep.subr.bf16.mxu0 %v1702_v19  ;;  %v1251_v19 = vld [vmem:[%s2013_s10 + $0x1] ss:$0 sm:$0xff] }
 0x527   :  { %1455 = vmatpush3.bf16.msra.mxu0 %v1550_v22  ;;  %v1263_v22 = vld [vmem:[%s2015_s12 + $0x1] ss:$0 sm:$0xff] }
 0x5dd   :  { %v875_v31 = vpop.f32.mrb[8].mxu0 }
 0x5de   :  { %v886_v32 = vadd.f32 %v884_v30, %v875_v31  ;;  %v1438_v17 = vpop.f32.mrb[9].mxu0 }
 0x5df   :  { %v878_v34 = vpop.f32.mrb[10].mxu0 }
 0x5e0   :  { %v887_v16 = vadd.f32 %v885_v33, %v878_v34  ;;  %v1439_v36 = vpop.f32.mrb[11].mxu0 }
 0x5e2   :  { %v888_v37 = vpack.c.bf16 %v887_v16, %v886_v32 }
 0x5e4   :  { %1457 = vmatmul.mubr.bf16.vlgmr.msra.gmra.mrb[12].mxu0 %v888_v37 }
 0x6b7   :  { %v996_v41 = vpop.f32.mrb[12].mxu0 }
 0x6b8   :  { %v997_v42 = vadd.f32 %v1241_v40, %v996_v41  ;;  %v1458_v43 = vpop.f32.mrb[13].mxu0 }
 0x6b9   :  { %v999_v44 = vpop.f32.mrb[14].mxu0 }
 0x6ba   :  { %v1000_v45 = vadd.f32 %v1241_v40, %v999_v44  ;;  %v1459_v46 = vpop.f32.mrb[15].mxu0  ;;  %v1003_v47 = vmax.f32 %v997_v42, 0.0 }
 0x6bc   :  { %v1004_v48 = vmax.f32 %v1000_v45, 0.0 }
 0x6be   :  { %v1005_v49 = vpack.c.bf16 %v1004_v48, %v1003_v47 }
 0x6c0   :  { %1477 = vmatmul.mubr.bf16.vlgmr.msra.gmra.mrb[12].mxu1 %v1005_v49 }
 0x793   :  { %v1113_v50 = vpop.f32.mrb[12].mxu1 }
 0x794   :  { %v1114_v51 = vadd.f32 %v1251_v19, %v1113_v50  ;;  %v1478_v52 = vpop.f32.mrb[13].mxu1 }
 0x795   :  { %v1116_v53 = vpop.f32.mrb[14].mxu1 }
 0x796   :  { %v1117_v54 = vadd.f32 %v1251_v19, %v1116_v53  ;;  %v1479_v55 = vpop.f32.mrb[15].mxu1  ;;  %v1130_v56 = vmul.f32 %v1114_v51, %v1114_v51 }
 0x798   :  { %v1122_v57 = vadd.f32 %v1117_v54, %v1114_v51  ;;  %v1131_v58 = vmul.f32 %v1117_v54, %v1117_v54 }
 0x79a   :  { %v1123_v59 = vrot.slane %v1122_v57, 4  ;;  %v1132_v60 = vadd.f32 %v1131_v58, %v1130_v56 }
 0x79c   :  { %v1124_v61 = vadd.f32 %v1123_v59, %v1122_v57  ;;  %v1133_v62 = vrot.slane %v1132_v60, 4 }
 0x79e   :  { %v1125_v63 = vrot.slane %v1124_v61, 2  ;;  %v1134_v0 = vadd.f32 %v1133_v62, %v1132_v60 }
 0x7a0   :  { %v1126_v1 = vadd.f32 %v1125_v63, %v1124_v61  ;;  %v1135_v2 = vrot.slane %v1134_v0, 2 }
 0x7a2   :  { %v1127_v3 = vrot.slane %v1126_v1, 1  ;;  %v1136_v4 = vadd.f32 %v1135_v2, %v1134_v0 }
 0x7a4   :  { %v1128_v5 = vadd.f32 %v1127_v3, %v1126_v1  ;;  %v1137_v6 = vrot.slane %v1136_v4, 1 }
 0x7a6   :  { %v1129_v7 = vmul.f32 0.0625, %v1128_v5  ;;  %v1138_v8 = vadd.f32 %v1137_v6, %v1136_v4 }
 0x7a8   :  { %v1139_v9 = vmul.f32 0.0625, %v1138_v8  ;;  %v1140_v10 = vmul.f32 %v1129_v7, %v1129_v7  ;;  %v1144_v18 = vsub.f32 %v1117_v54, %v1129_v7  ;;  %v1143_v11 = vsub.f32 %v1114_v51, %v1129_v7 }
 0x7aa   :  { %v1141_v12 = vsub.f32 %v1139_v9, %v1140_v10 }
 0x7ac   :  { %v1142_v13 = vmax.f32 %v1141_v12, 0.0 }
 0x7ae   :  { %v1145_v14 = vadd.f32 1e-05, %v1142_v13 }
 0x7b0   :  { %1561 = vrsqrt.f32 %v1145_v14 }
 0x7ba   :  { %v1562_v15 = vpop.eup %1561 }
 0x7bb   :  { %v1147_v35 = vmul.f32 %v1562_v15, %v1143_v11  ;;  %v1148_v21 = vmul.f32 %v1562_v15, %v1144_v18 }
 0x7bd   :  { %v1157_v23 = vmul.f32 %v1261_v20, %v1147_v35  ;;  %v1158_v24 = vmul.f32 %v1261_v20, %v1148_v21 }
 0x7bf   :  { %v1167_v25 = vadd.f32 %v1263_v22, %v1157_v23  ;;  %v1168_v26 = vadd.f32 %v1263_v22, %v1158_v24 }
 0x7c1   :  { %1169 = vst [vmem:[#allocation12] sm:$0xff] %v1167_v25  ;;  %1170 = vst [vmem:[#allocation12 + $0x8] sm:$0xff] %v1168_v26 }
 0x7c2   :  { %1672 = shalt.err (!%p1669_p11)
}
 0x7c3   :  { %s1673_s12 = scalar_lea.hbm %s2016_s13, 256 }
 0x7c4   :  { %p1674_p12 = scmp.ne.s32.totalorder %s2016_s13, %s1673_s12  ;;  %p1677_p13 = scmp.lt.u32.totalorder %s1673_s12, %s2016_s13 }
 0x7c6   :  { %p1679_p0 = pnand %p1677_p13, %p1674_p12 }
 0x7c8   :  { %1682 = shalt.err (!%p1679_p0)
}
 0x7c9   :  { %1182 = dma.vmem_to_hbm [thread:$0]  %s1177_s26, 256, %s2016_s13, [#allocation4], %s1698_s0, %s1698_s0, %s1699_s27  }
 0x7ca   :  { %1691 = dma.done.wait [#allocation4], 256  }
 0x7cb   :  { %1692 = vsyncadd [#allocation4], 4294967040 }
 0x7cc   :  { %1186 = vsyncpa [#allocation3], 1 }
 0x7cd   :  { %1187 = vsyncpa [#allocation8], 1 }
 0x7ce   :  { %1188 = vsyncpa [#allocation11], 1 }
 0x7cf   :  { %1189 = vsyncpa [#allocation4], 1 }
 0x7d0   :  { %1190 = vsyncpa [#allocation5], 1 }

</bundles_post_ra>
